<compile_context>
chip_gen: v7x
topology: tpu7x:2x2x1
jax: 0.10.0
libtpu: 0.0.40
codegen_flags: <defaults>
</compile_context>

<pallas_src>
import functools
import math

import numpy as np
from typing import NamedTuple

import jax
import jax.numpy as jnp
from jax.experimental import pallas as pl
from jax.experimental.pallas import tpu as pltpu


def _round_up(n: int, m: int) -> int:
    return ((n + m - 1) // m) * m


def _tpu_vmem_capacity_bytes() -> int:
    try:
        cap = getattr(pltpu.get_tpu_info(), "vmem_capacity_bytes", None)
        if cap:
            return int(cap)
    except Exception:
        pass
    return 64 * 1024 * 1024  # conservative: v7x per-TensorCore VMEM


def _tpu_num_tensorcores() -> int:
    try:
        info = pltpu.get_tpu_info()
        for name in ("num_cores", "core_count", "num_tensorcores", "tensorcores_per_chip"):
            v = getattr(info, name, None)
            if isinstance(v, int) and 1 <= v <= 8:
                return v
    except Exception:
        pass
    return 1


def _vmem_limit(need_bytes: int, cap_bytes: int) -> int:
    """Sized VMEM limit: ~1.5x the computed need + slack, clamped below physical."""
    lo = 32 << 20
    hi = int(cap_bytes * 0.9)
    want = int(need_bytes * 1.5) + (4 << 20)
    return max(min(want, hi), min(lo, hi))


# --------------------------------------------------------------------------------------
# Parameter preparation (done ONCE, not per forward call)
# --------------------------------------------------------------------------------------
class PreparedParams(NamedTuple):
    w1: jax.Array
    b1: jax.Array
    w2: jax.Array
    b2: jax.Array
    w3: jax.Array
    b3: jax.Array
    in_dim: int
    hid: int
    ncls: int
    in_p: int
    hid_p: int
    ncls_p: int


def prepare_params(params, *, mxu_dtype=jnp.bfloat16) -> PreparedParams:
    """Pad feature dims to multiples of 128 and cast weights to the MXU dtype once."""
    w1, b1, w2, b2, w3, b3 = params
    in_dim, hid = w1.shape
    ncls = w3.shape[1]
    in_p, hid_p, ncls_p = (_round_up(d, 128) for d in (in_dim, hid, ncls))
    f32 = jnp.float32

    def pad(a, shape, dtype):
        return jnp.zeros(shape, dtype).at[: a.shape[0], : a.shape[1]].set(a.astype(dtype))

    return PreparedParams(
        w1=pad(w1, (in_p, hid_p), mxu_dtype),
        b1=pad(b1, (1, hid_p), f32),
        w2=pad(w2, (hid_p, hid_p), mxu_dtype),
        b2=pad(b2, (1, hid_p), f32),
        w3=pad(w3, (hid_p, ncls_p), mxu_dtype),
        b3=pad(b3, (1, ncls_p), f32),
        in_dim=in_dim, hid=hid, ncls=ncls,
        in_p=in_p, hid_p=hid_p, ncls_p=ncls_p,
    )


# --------------------------------------------------------------------------------------
# Fused kernel: whole MLP on one batch tile, weights resident in VMEM
# --------------------------------------------------------------------------------------
def mlp_kernel(x_ref, w1_ref, b1_ref, w2_ref, b2_ref, w3_ref, b3_ref, o_ref):
    """relu(relu(x@W1+b1)@W2+b2)@W3+b3 ; f32 accumulation, f32 bias/ReLU epilogue."""
    w_dtype = w1_ref.dtype
    x = x_ref[...]                               # already cast to MXU dtype in the wrapper
    h1 = jnp.dot(x, w1_ref[...], preferred_element_type=jnp.float32)
    h1 = jnp.maximum(h1 + b1_ref[...], 0.0)
    h2 = jnp.dot(h1.astype(w_dtype), w2_ref[...], preferred_element_type=jnp.float32)
    h2 = jnp.maximum(h2 + b2_ref[...], 0.0)
    out = jnp.dot(h2.astype(w_dtype), w3_ref[...], preferred_element_type=jnp.float32)
    o_ref[...] = (out + b3_ref[...]).astype(o_ref.dtype)


# --------------------------------------------------------------------------------------
# Unfused fallback: per-layer (M, N, K)-tiled matmul + bias (+ ReLU)
# --------------------------------------------------------------------------------------
def _linear_kernel(x_ref, w_ref, b_ref, o_ref, acc_ref, *, relu):
    @pl.when(pl.program_id(2) == 0)
    def _init():
        acc_ref[...] = jnp.zeros_like(acc_ref)

    acc_ref[...] += jnp.dot(x_ref[...], w_ref[...], preferred_element_type=jnp.float32)

    @pl.when(pl.program_id(2) == pl.num_programs(2) - 1)
    def _finalize():
        y = acc_ref[...] + b_ref[...]
        if relu:
            y = jnp.maximum(y, 0.0)
        o_ref[...] = y.astype(o_ref.dtype)


def _linear_pallas(x, w, b, *, relu, out_dtype, cap):
    M, K = x.shape
    _, N = w.shape
    tm = min(M, 256)                     # M is a padded multiple of tm by construction
    tn = math.gcd(N, 256)
    tk = math.gcd(K, 512)
    isz_x = x.dtype.itemsize
    isz_w = w.dtype.itemsize
    isz_o = np.dtype(out_dtype).itemsize
    need = (2 * tm * tk * isz_x + 2 * tk * tn * isz_w + 2 * tn * 4
            + 2 * tm * tn * isz_o + tm * tn * 4)
    return pl.pallas_call(
        functools.partial(_linear_kernel, relu=relu),
        out_shape=jax.ShapeDtypeStruct((M, N), out_dtype),
        grid_spec=pltpu.PrefetchScalarGridSpec(
            num_scalar_prefetch=0,
            grid=(M // tm, N // tn, K // tk),
            in_specs=[
                pl.BlockSpec((tm, tk), lambda i, j, k: (i, k)),
                pl.BlockSpec((tk, tn), lambda i, j, k: (k, j)),
                pl.BlockSpec((1, tn), lambda i, j, k: (0, j)),
            ],
            out_specs=pl.BlockSpec((tm, tn), lambda i, j, k: (i, j)),
            scratch_shapes=[pltpu.VMEM((tm, tn), jnp.float32)],
        ),
        compiler_params=pltpu.CompilerParams(
            dimension_semantics=("parallel", "parallel", "arbitrary"),
            vmem_limit_bytes=_vmem_limit(need, cap),
        ),
    )(x, w, b)


# --------------------------------------------------------------------------------------
# Forward wrapper
# --------------------------------------------------------------------------------------
def neural_net_forward(x, params, *, max_batch_tile=None, num_tensorcores=None,
                       force_unfused=False, unpad=True):
    """Pallas forward of NeuralNet.

    x: [B, input_size] float32.  params: PreparedParams (preferred; prepare once) or a
    raw (w1, b1, w2, b2, w3, b3) tuple with weights pre-transposed to [in, out] and
    biases shaped [1, out] (will be padded per call -- avoid in hot loops).
    """
    prep = params if isinstance(params, PreparedParams) else prepare_params(params)
    B, in_dim = x.shape
    assert in_dim == prep.in_dim
    in_p, hid_p, ncls_p = prep.in_p, prep.hid_p, prep.ncls_p
    mxu_dtype = prep.w1.dtype
    itemsize = mxu_dtype.itemsize
    f32 = jnp.float32

    cap = _tpu_vmem_capacity_bytes()
    budget = int(cap * 0.8)
    if max_batch_tile is None:
        max_batch_tile = 512 if cap >= (96 << 20) else 256
    num_tc = _tpu_num_tensorcores() if num_tensorcores is None else num_tensorcores

    # VMEM accounting (bytes): resident weights are single-buffered; x / out tiles are
    # double-buffered by the pipeline; h1/h2 temporaries + their MXU-input casts.
    resident = ((in_p * hid_p + hid_p * hid_p + hid_p * ncls_p) * itemsize
                + (2 * hid_p + ncls_p) * 4)
    per_row = (2 * in_p * itemsize          # streamed x tile (double-buffered)
               + 2 * ncls_p * 4             # streamed out tile (double-buffered)
               + 2 * hid_p * 4              # h1 / h2 f32 temporaries
               + 2 * hid_p * itemsize)      # h1 / h2 casts feeding the MXU

    # Batch tile: as large as the budget allows; split across TensorCores when >1.
    tb = min(_round_up(B, 8), max_batch_tile)
    if num_tc > 1 and B > 8:
        tb = min(tb, max(8, _round_up(-(-B // num_tc), 8)))
    while tb > 8 and resident + tb * per_row > budget:
        tb = max(8, _round_up(tb // 2, 8))

    use_fused = (not force_unfused) and (resident + tb * per_row <= budget)

    if use_fused:
        bp = _round_up(B, tb)
        n_steps = bp // tb
        # Pad + cast x in one fused op (only per-call HBM prep that remains).
        xp = jnp.zeros((bp, in_p), mxu_dtype).at[:B, :in_dim].set(x.astype(mxu_dtype))

        def resident_spec(shape):
            # Constant block index across the grid -> single-buffer (half the VMEM).
            return pl.BlockSpec(shape, lambda i: (0, 0), pipeline_mode=pl.Buffered(1))

        need = resident + tb * per_row
        out_padded = pl.pallas_call(
            mlp_kernel,
            out_shape=jax.ShapeDtypeStruct((bp, ncls_p), f32),
            grid_spec=pltpu.PrefetchScalarGridSpec(
                num_scalar_prefetch=0,
                grid=(n_steps,),
                in_specs=[
                    pl.BlockSpec((tb, in_p), lambda i: (i, 0)),   # x tile (pipelined)
                    resident_spec((in_p, hid_p)),                 # W1
                    resident_spec((1, hid_p)),                    # b1
                    resident_spec((hid_p, hid_p)),                # W2
                    resident_spec((1, hid_p)),                    # b2
                    resident_spec((hid_p, ncls_p)),               # W3
                    resident_spec((1, ncls_p)),                   # b3
                ],
                out_specs=pl.BlockSpec((tb, ncls_p), lambda i: (i, 0)),
            ),
            compiler_params=pltpu.CompilerParams(
                dimension_semantics=("parallel",) if n_steps > 1 else ("arbitrary",),
                vmem_limit_bytes=_vmem_limit(need, cap),
            ),
        )(xp, prep.w1, prep.b1, prep.w2, prep.b2, prep.w3, prep.b3)
    else:
        # Hidden dim too large for resident weights: three per-layer tiled kernels.
        tm = min(_round_up(B, 8), 256)
        bp = _round_up(B, tm)
        xp = jnp.zeros((bp, in_p), mxu_dtype).at[:B, :in_dim].set(x.astype(mxu_dtype))
        h1 = _linear_pallas(xp, prep.w1, prep.b1, relu=True, out_dtype=mxu_dtype, cap=cap)
        h2 = _linear_pallas(h1, prep.w2, prep.b2, relu=True, out_dtype=mxu_dtype, cap=cap)
        out_padded = _linear_pallas(h2, prep.w3, prep.b3, relu=False, out_dtype=f32, cap=cap)

    if unpad:
        # NOTE: for very large B with ncls << 128, prefer unpad=False and let the
        # downstream op (argmax/softmax inside the same jit) consume the padded slab.
        return out_padded[:B, :prep.ncls]
    return out_padded


# --------------------------------------------------------------------------------------
# Reference + init
# --------------------------------------------------------------------------------------
def init_params(key, input_size, hidden_size, num_classes):
    """Uniform init like PyTorch's default nn.Linear init; weights stored [in, out]."""
    ks = jax.random.split(key, 6)

    def linear(kw, kb, fan_in, fan_out):
        bound = 1.0 / float(np.sqrt(fan_in))
        w = jax.random.uniform(kw, (fan_in, fan_out), jnp.float32, -bound, bound)
        b = jax.random.uniform(kb, (1, fan_out), jnp.float32, -bound, bound)
        return w, b

    w1, b1 = linear(ks[0], ks[1], input_size, hidden_size)
    w2, b2 = linear(ks[2], ks[3], hidden_size, hidden_size)
    w3, b3 = linear(ks[4], ks[5], hidden_size, num_classes)
    return (w1, b1, w2, b2, w3, b3)


def reference_forward(x, params):
    w1, b1, w2, b2, w3, b3 = params
    h1 = jnp.maximum(x @ w1 + b1, 0.0)
    h2 = jnp.maximum(h1 @ w2 + b2, 0.0)
    return h2 @ w3 + b3


if __name__ == "__main__":
    input_size, hidden_size, num_classes = 64, 32, 16

    key = jax.random.PRNGKey(0)
    kx, kp, kx2 = jax.random.split(key, 3)
    params = init_params(kp, input_size, hidden_size, num_classes)

    # Prepared (padded/cast) params are built ONCE and reused across calls.
    prep_bf16 = prepare_params(params)                          # bf16 MXU (default)
    prep_f32 = prepare_params(params, mxu_dtype=jnp.float32)    # f32 MXU

    # Path 1: small batch, bf16 MXU inputs / f32 accumulation (fused, resident weights).
    x = jax.random.normal(kx, (16, input_size), jnp.float32)
    ref = reference_forward(x, params)
    out = jax.block_until_ready(neural_net_forward(x, prep_bf16))
    assert out.shape == (16, num_classes)
    assert jnp.allclose(out, ref, atol=5e-2, rtol=5e-2), "bf16 fused mismatch vs reference"

    # Path 2: f32 MXU, multi-step batch-tiled grid (exercises pipelined x stream +
    # single-buffered resident weights across grid steps).
    x2 = jax.random.normal(kx2, (160, input_size), jnp.float32)
    ref2 = reference_forward(x2, params)
    out2 = jax.block_until_ready(neural_net_forward(x2, prep_f32, max_batch_tile=64))
    assert out2.shape == (160, num_classes)
    assert jnp.allclose(out2, ref2, atol=1e-5, rtol=1e-5), "f32 tiled mismatch vs reference"

    # Path 3: unfused fallback (per-layer K-tiled matmuls) forced for coverage; used
    # automatically when resident weights exceed the VMEM budget (hidden ~4-7k).
    out3 = jax.block_until_ready(neural_net_forward(x, prep_bf16, force_unfused=True))
    assert out3.shape == (16, num_classes)
    assert jnp.allclose(out3, ref, atol=5e-2, rtol=5e-2), "fallback mismatch vs reference"

    print("KERNEL_OK")
</pallas_src>

<mosaic_0001>
module attributes {stable_mosaic.version = 11 : i64} {
  func.func @mlp_kernel(%arg0: i32, %arg1: memref<16x128xbf16, #tpu.memory_space<vmem>>, %arg2: memref<128x128xbf16, #tpu.memory_space<vmem>>, %arg3: memref<1x128xf32, #tpu.memory_space<vmem>>, %arg4: memref<128x128xbf16, #tpu.memory_space<vmem>>, %arg5: memref<1x128xf32, #tpu.memory_space<vmem>>, %arg6: memref<128x128xbf16, #tpu.memory_space<vmem>>, %arg7: memref<1x128xf32, #tpu.memory_space<vmem>>, %arg8: memref<16x128xf32, #tpu.memory_space<vmem>>) attributes {dimension_semantics = [#tpu.dimension_semantics<arbitrary>], iteration_bounds = array<i64: 1>, scalar_prefetch = 0 : i64, scratch_operands = 0 : i64, tpu.core_type = #tpu.core_type<tc>, window_params = [{transform_indices = @transform_0, window_bounds = array<i64: 16, 128>}, {pipeline_mode = #tpu.pipeline_mode<synchronous>, transform_indices = @transform_1, window_bounds = array<i64: 128, 128>}, {pipeline_mode = #tpu.pipeline_mode<synchronous>, transform_indices = @transform_2, window_bounds = array<i64: 1, 128>}, {pipeline_mode = #tpu.pipeline_mode<synchronous>, transform_indices = @transform_3, window_bounds = array<i64: 128, 128>}, {pipeline_mode = #tpu.pipeline_mode<synchronous>, transform_indices = @transform_4, window_bounds = array<i64: 1, 128>}, {pipeline_mode = #tpu.pipeline_mode<synchronous>, transform_indices = @transform_5, window_bounds = array<i64: 128, 128>}, {pipeline_mode = #tpu.pipeline_mode<synchronous>, transform_indices = @transform_6, window_bounds = array<i64: 1, 128>}, {transform_indices = @transform_7, window_bounds = array<i64: 16, 128>}]} {
    %c0 = arith.constant 0 : index
    %c0_0 = arith.constant 0 : index
    %0 = vector.load %arg1[%c0, %c0_0] : memref<16x128xbf16, #tpu.memory_space<vmem>>, vector<16x128xbf16>
    %c0_1 = arith.constant 0 : index
    %c0_2 = arith.constant 0 : index
    %1 = vector.load %arg2[%c0_1, %c0_2] : memref<128x128xbf16, #tpu.memory_space<vmem>>, vector<128x128xbf16>
    %cst = arith.constant dense<0.000000e+00> : vector<16x128xf32>
    %2 = tpu.matmul %0, %1, %cst {dimension_numbers = #tpu.dot_dimension_numbers<[1], [0], [0], [1], [0, 0, 1, 1], [], []>} : vector<16x128xbf16>, vector<128x128xbf16>, vector<16x128xf32> -> vector<16x128xf32>
    %c0_3 = arith.constant 0 : index
    %c0_4 = arith.constant 0 : index
    %3 = vector.load %arg3[%c0_3, %c0_4] : memref<1x128xf32, #tpu.memory_space<vmem>>, vector<1x128xf32>
    %4 = vector.broadcast %3 : vector<1x128xf32> to vector<16x128xf32>
    %5 = arith.addf %2, %4 : vector<16x128xf32>
    %cst_5 = arith.constant 0.000000e+00 : f32
    %6 = vector.broadcast %cst_5 : f32 to vector<16x128xf32>
    %7 = arith.maximumf %5, %6 : vector<16x128xf32>
    %8 = arith.truncf %7 : vector<16x128xf32> to vector<16x128xbf16>
    %c0_6 = arith.constant 0 : index
    %c0_7 = arith.constant 0 : index
    %9 = vector.load %arg4[%c0_6, %c0_7] : memref<128x128xbf16, #tpu.memory_space<vmem>>, vector<128x128xbf16>
    %cst_8 = arith.constant dense<0.000000e+00> : vector<16x128xf32>
    %10 = tpu.matmul %8, %9, %cst_8 {dimension_numbers = #tpu.dot_dimension_numbers<[1], [0], [0], [1], [0, 0, 1, 1], [], []>} : vector<16x128xbf16>, vector<128x128xbf16>, vector<16x128xf32> -> vector<16x128xf32>
    %c0_9 = arith.constant 0 : index
    %c0_10 = arith.constant 0 : index
    %11 = vector.load %arg5[%c0_9, %c0_10] : memref<1x128xf32, #tpu.memory_space<vmem>>, vector<1x128xf32>
    %12 = vector.broadcast %11 : vector<1x128xf32> to vector<16x128xf32>
    %13 = arith.addf %10, %12 : vector<16x128xf32>
    %cst_11 = arith.constant 0.000000e+00 : f32
    %14 = vector.broadcast %cst_11 : f32 to vector<16x128xf32>
    %15 = arith.maximumf %13, %14 : vector<16x128xf32>
    %16 = arith.truncf %15 : vector<16x128xf32> to vector<16x128xbf16>
    %c0_12 = arith.constant 0 : index
    %c0_13 = arith.constant 0 : index
    %17 = vector.load %arg6[%c0_12, %c0_13] : memref<128x128xbf16, #tpu.memory_space<vmem>>, vector<128x128xbf16>
    %cst_14 = arith.constant dense<0.000000e+00> : vector<16x128xf32>
    %18 = tpu.matmul %16, %17, %cst_14 {dimension_numbers = #tpu.dot_dimension_numbers<[1], [0], [0], [1], [0, 0, 1, 1], [], []>} : vector<16x128xbf16>, vector<128x128xbf16>, vector<16x128xf32> -> vector<16x128xf32>
    %c0_15 = arith.constant 0 : index
    %c0_16 = arith.constant 0 : index
    %19 = vector.load %arg7[%c0_15, %c0_16] : memref<1x128xf32, #tpu.memory_space<vmem>>, vector<1x128xf32>
    %20 = vector.broadcast %19 : vector<1x128xf32> to vector<16x128xf32>
    %21 = arith.addf %18, %20 : vector<16x128xf32>
    %c0_17 = arith.constant 0 : index
    %c0_18 = arith.constant 0 : index
    %22 = vector.load %arg8[%c0_17, %c0_18] : memref<16x128xf32, #tpu.memory_space<vmem>>, vector<16x128xf32>
    tpu.vector_store %arg8[%c0_17, %c0_18], %21 {strides = array<i32>} : memref<16x128xf32, #tpu.memory_space<vmem>>, vector<16x128xf32>,
    return
  }
  func.func @transform_0(%arg0: i32) -> (i32, i32) {
    %c0_i32 = arith.constant 0 : i32
    %c0_i32_0 = arith.constant 0 : i32
    return %arg0, %c0_i32 : i32, i32
  }
  func.func @transform_1(%arg0: i32) -> (i32, i32) {
    %c0_i32 = arith.constant 0 : i32
    %c0_i32_0 = arith.constant 0 : i32
    %c0_i32_1 = arith.constant 0 : i32
    return %c0_i32, %c0_i32_0 : i32, i32
  }
  func.func @transform_2(%arg0: i32) -> (i32, i32) {
    %c0_i32 = arith.constant 0 : i32
    %c0_i32_0 = arith.constant 0 : i32
    %c0_i32_1 = arith.constant 0 : i32
    return %c0_i32, %c0_i32_0 : i32, i32
  }
  func.func @transform_3(%arg0: i32) -> (i32, i32) {
    %c0_i32 = arith.constant 0 : i32
    %c0_i32_0 = arith.constant 0 : i32
    %c0_i32_1 = arith.constant 0 : i32
    return %c0_i32, %c0_i32_0 : i32, i32
  }
  func.func @transform_4(%arg0: i32) -> (i32, i32) {
    %c0_i32 = arith.constant 0 : i32
    %c0_i32_0 = arith.constant 0 : i32
    %c0_i32_1 = arith.constant 0 : i32
    return %c0_i32, %c0_i32_0 : i32, i32
  }
  func.func @transform_5(%arg0: i32) -> (i32, i32) {
    %c0_i32 = arith.constant 0 : i32
    %c0_i32_0 = arith.constant 0 : i32
    %c0_i32_1 = arith.constant 0 : i32
    return %c0_i32, %c0_i32_0 : i32, i32
  }
  func.func @transform_6(%arg0: i32) -> (i32, i32) {
    %c0_i32 = arith.constant 0 : i32
    %c0_i32_0 = arith.constant 0 : i32
    %c0_i32_1 = arith.constant 0 : i32
    return %c0_i32, %c0_i32_0 : i32, i32
  }
  func.func @transform_7(%arg0: i32) -> (i32, i32) {
    %c0_i32 = arith.constant 0 : i32
    %c0_i32_0 = arith.constant 0 : i32
    return %arg0, %c0_i32 : i32, i32
  }
}

</mosaic_0001>

<bundles_post_ra>
// kernel: tpu_custom_call.1
= control target key start
LH: loop header
LB: loop body
LE: loop exit
PB: predicated region body
PF: predicated region fallthrough
CT: control target
= control target key end

     0   :  { %12 = vsyncpa [#allocation3], 0  ;;  %s899_s0 = inlined_call_operand.hbm [shape: bf16[16,128], index: 0, kind: input, shape index: {}]   ;;  %s900_s1 = inlined_call_operand.hbm [shape: bf16[128,128], index: 1, kind: input, shape index: {}]   ;;  %s901_s2 = inlined_call_operand.vmem [shape: f32[1,128], index: 2, kind: input, shape index: {}]   ;;  %s902_s3 = inlined_call_operand.hbm [shape: bf16[128,128], index: 3, kind: input, shape index: {}]   ;;  %s903_s4 = inlined_call_operand.vmem [shape: f32[1,128], index: 4, kind: input, shape index: {}]   ;;  %s904_s5 = inlined_call_operand.hbm [shape: bf16[128,128], index: 5, kind: input, shape index: {}]   ;;  %s905_s6 = inlined_call_operand.vmem [shape: f32[1,128], index: 6, kind: input, shape index: {}]   ;;  %s906_s7 = inlined_call_operand.hbm [shape: f32[16,128], index: 7, kind: output, shape index: {}]  }
   0x1   :  { %13 = vsyncpa [#allocation6], 0 }
   0x2   :  { %14 = vsyncpa [#allocation9], 0 }
   0x3   :  { %15 = vsyncpa [#allocation4], 0  ;;  %s723_s24 = smov [#allocation5]   ;;  %s724_s26 = smov [#allocation2]  }
   0x4   :  { %s33_s25 = sshll.u32 %s723_s24, 4  ;;  %s21_s27 = sshll.u32 %s724_s26, 4  ;;  %s34_s25 = int_to_ptr.vmem [resolvable:$true] %s33_s25  ;;  %s774_s27 = int_to_ptr.vmem [resolvable:$true] %s21_s27 }
   0x5   :  { %s605_s30 = scalar_lea.hbm %s900_s1, 1024 }
   0x6   :  { %p606_p0 = scmp.ne.s32.totalorder %s900_s1, %s605_s30  ;;  %p609_p1 = scmp.lt.u32.totalorder %s605_s30, %s900_s1 }
   0x8   :  { %p611_p2 = pnand %p609_p1, %p606_p0 }
   0xa   :  { %614 = shalt.err (!%p611_p2)
}
   0xb   :  { %s615_s12 = scalar_lea.vmem %s34_s25, 1024  ;;  %p620_p4 = scmp.lt.s32.totalorder %s34_s25, %s34_s25 }
   0xc   :  { %p616_p3 = scmp.ne.s32.totalorder %s34_s25, %s615_s12  ;;  %p621_p5 = scmp.lt.s32.totalorder %s615_s12, %s615_s12 }
   0xe   :  { %p622_p6 = por %p621_p5, %p620_p4 }
  0x10   :  { %p623_p7 = pnand %p622_p6, %p616_p3 }
  0x12   :  { %626 = shalt.err (!%p623_p7)
}
  0x13   :  { %s725_s13 = smov 64   ;;  %s726_s14 = smov 4  }
  0x14   :  { %39 = dma.hbm_to_vmem [thread:$0]  %s900_s1, 1024, %s34_s25, [#allocation6], %s725_s13, %s725_s13, %s726_s14  }
  0x15   :  { %s627_s19 = scalar_lea.hbm %s899_s0, 128 }
  0x16   :  { %p628_p8 = scmp.ne.s32.totalorder %s899_s0, %s627_s19  ;;  %p631_p9 = scmp.lt.u32.totalorder %s627_s19, %s899_s0 }
  0x18   :  { %p633_p10 = pnand %p631_p9, %p628_p8 }
  0x1a   :  { %636 = shalt.err (!%p633_p10)
}
  0x1b   :  { %s637_s24 = scalar_lea.vmem %s774_s27, 128  ;;  %p642_p12 = scmp.lt.s32.totalorder %s774_s27, %s774_s27 }
  0x1c   :  { %p638_p11 = scmp.ne.s32.totalorder %s774_s27, %s637_s24  ;;  %p643_p13 = scmp.lt.s32.totalorder %s637_s24, %s637_s24 }
  0x1e   :  { %p644_p0 = por %p643_p13, %p642_p12 }
  0x20   :  { %p645_p1 = pnand %p644_p0, %p638_p11 }
  0x22   :  { %648 = shalt.err (!%p645_p1)
}
  0x23   :  { %27 = dma.hbm_to_vmem [thread:$0]  %s899_s0, 128, %s774_s27, [#allocation3], %s725_s13, %s725_s13, %s726_s14  }
  0x24   :  { %s727_s26 = smov [#allocation7]   ;;  %s728_s29 = smov [#allocation8]  }
  0x25   :  { %s47_s28 = sshll.u32 %s727_s26, 4  ;;  %s61_s30 = sshll.u32 %s728_s29, 4  ;;  %s48_s28 = int_to_ptr.vmem [resolvable:$true] %s47_s28  ;;  %s811_s30 = int_to_ptr.vmem [resolvable:$true] %s61_s30 }
  0x26   :  { %s649_s10 = scalar_lea.hbm %s902_s3, 1024 }
  0x27   :  { %p650_p2 = scmp.ne.s32.totalorder %s902_s3, %s649_s10  ;;  %p653_p3 = scmp.lt.u32.totalorder %s649_s10, %s902_s3 }
  0x29   :  { %p655_p4 = pnand %p653_p3, %p650_p2 }
  0x2b   :  { %658 = shalt.err (!%p655_p4)
}
  0x2c   :  { %s659_s0 = scalar_lea.vmem %s48_s28, 1024  ;;  %p664_p6 = scmp.lt.s32.totalorder %s48_s28, %s48_s28 }
  0x2d   :  { %p660_p5 = scmp.ne.s32.totalorder %s48_s28, %s659_s0  ;;  %p665_p7 = scmp.lt.s32.totalorder %s659_s0, %s659_s0 }
  0x2f   :  { %p666_p8 = por %p665_p7, %p664_p6 }
  0x31   :  { %p667_p9 = pnand %p666_p8, %p660_p5 }
  0x33   :  { %670 = shalt.err (!%p667_p9)
}
  0x34   :  { %53 = dma.hbm_to_vmem [thread:$0]  %s902_s3, 1024, %s48_s28, [#allocation6], %s725_s13, %s725_s13, %s726_s14  }
  0x35   :  { %s671_s20 = scalar_lea.hbm %s904_s5, 1024 }
  0x36   :  { %p672_p10 = scmp.ne.s32.totalorder %s904_s5, %s671_s20  ;;  %p675_p11 = scmp.lt.u32.totalorder %s671_s20, %s904_s5 }
  0x38   :  { %p677_p12 = pnand %p675_p11, %p672_p10 }
  0x3a   :  { %680 = shalt.err (!%p677_p12)
}
  0x3b   :  { %s681_s1 = scalar_lea.vmem %s811_s30, 1024  ;;  %p686_p0 = scmp.lt.s32.totalorder %s811_s30, %s811_s30 }
  0x3c   :  { %p682_p13 = scmp.ne.s32.totalorder %s811_s30, %s681_s1  ;;  %p687_p1 = scmp.lt.s32.totalorder %s681_s1, %s681_s1 }
  0x3e   :  { %p688_p2 = por %p687_p1, %p686_p0 }
  0x40   :  { %p689_p3 = pnand %p688_p2, %p682_p13 }
  0x42   :  { %692 = shalt.err (!%p689_p3)
}
  0x43   :  { %67 = dma.hbm_to_vmem [thread:$0]  %s904_s5, 1024, %s811_s30, [#allocation9], %s725_s13, %s725_s13, %s726_s14  }
  0x44   :  { %715 = dma.done.wait [#allocation3], 128  }
  0x45   :  { %716 = vsyncadd [#allocation3], 4294967168 }
  0x46   :  { %717 = dma.done.wait [#allocation6], 2048  }
  0x47   :  { %718 = vsyncadd [#allocation6], 4294965248 }
  0x48   :  { %719 = dma.done.wait [#allocation9], 1024  }
  0x49   :  { %720 = vsyncadd [#allocation9], 4294966272  ;;  %v729_v0 = vmov 0.0   ;;  %vm730_vm0 = vmmov 0   ;;  %v580_v1 = vld [vmem:[#allocation5] sm:$0xff]   ;;  %v581_v2 = vld [vmem:[#allocation5 + $0x8] sm:$0xff]  }
  0x4a   :  { %509 = vmatprep.subr.bf16.mxu0 %v729_v0  ;;  %525 = vmatprep.mubr.msk.bf16.mxu0 %vm730_vm0, %v729_v0  ;;  %v582_v3 = vld [vmem:[#allocation5 + $0x10] sm:$0xff]   ;;  %v589_v4 = vld [vmem:[#allocation7] sm:$0xff]   ;;  %v583_v5 = vld [vmem:[#allocation5 + $0x18] sm:$0xff]   ;;  %s731_s29 = smov [#allocation10]  }
  0x4b   :  { %529 = vmatprep.subr.bf16.mxu1 %v729_v0  ;;  %545 = vmatprep.mubr.msk.bf16.mxu1 %vm730_vm0, %v729_v0  ;;  %v590_v6 = vld [vmem:[#allocation7 + $0x8] sm:$0xff]   ;;  %v584_v7 = vld [vmem:[#allocation5 + $0x20] sm:$0xff]   ;;  %v591_v8 = vld [vmem:[#allocation7 + $0x10] sm:$0xff]   ;;  %s440_s30 = sshll.u32 %s731_s29, 4  ;;  %s441_s30 = int_to_ptr.vmem [resolvable:$true] %s440_s30 }
  0x4c   :  { %510 = vmatpush3.bf16.msra.mxu0 %v580_v1  ;;  %530 = vmatpush3.bf16.msra.mxu1 %v589_v4  ;;  %v585_v9 = vld [vmem:[#allocation5 + $0x28] sm:$0xff]   ;;  %v592_v10 = vld [vmem:[#allocation7 + $0x18] sm:$0xff]   ;;  %v586_v11 = vld [vmem:[#allocation5 + $0x30] sm:$0xff]   ;;  %p698_p5 = scmp.lt.s32.totalorder %s441_s30, %s441_s30 }
  0x4d   :  { %511 = vmatprep.subr.bf16.mxu0 %v729_v0  ;;  %531 = vmatprep.subr.bf16.mxu1 %v729_v0  ;;  %v593_v12 = vld [vmem:[#allocation7 + $0x20] sm:$0xff]   ;;  %v587_v13 = vld [vmem:[#allocation5 + $0x38] sm:$0xff]   ;;  %v594_v14 = vld [vmem:[#allocation7 + $0x28] sm:$0xff]  }
  0x4e   :  { %v588_v15 = vld [vmem:[#allocation2] sm:$0xff]   ;;  %v595_v16 = vld [vmem:[#allocation7 + $0x30] sm:$0xff]   ;;  %v597_v18 = vld [vmem:[#allocation8] sm:$0xff]  }
  0x4f   :  { %v596_v17 = vld [vmem:[#allocation7 + $0x38] sm:$0xff]   ;;  %v598_v19 = vld [vmem:[#allocation8 + $0x8] sm:$0xff]   ;;  %v599_v20 = vld [vmem:[#allocation8 + $0x10] sm:$0xff]  }
  0x50   :  { %512 = vmatpush3.bf16.msra.mxu0 %v581_v2  ;;  %532 = vmatpush3.bf16.msra.mxu1 %v590_v6  ;;  %v600_v21 = vld [vmem:[#allocation8 + $0x18] sm:$0xff]   ;;  %v601_v22 = vld [vmem:[#allocation8 + $0x20] sm:$0xff]   ;;  %v602_v23 = vld [vmem:[#allocation8 + $0x28] sm:$0xff]  }
  0x51   :  { %513 = vmatprep.subr.bf16.mxu0 %v729_v0  ;;  %533 = vmatprep.subr.bf16.mxu1 %v729_v0  ;;  %v454_v24 = vld [vmem:[%s901_s2] ss:$0 sm:$0xff]  ;;  %v603_v34 = vld [vmem:[#allocation8 + $0x30] sm:$0xff]  }
  0x52   :  { %v604_v35 = vld [vmem:[#allocation8 + $0x38] sm:$0xff]  }
  0x53   :  { %v464_v36 = vld [vmem:[%s903_s4] ss:$0 sm:$0xff]  ;;  %s693_s4 = scalar_lea.vmem %s441_s30, 256 }
  0x54   :  { %514 = vmatpush3.bf16.msra.mxu0 %v582_v3  ;;  %534 = vmatpush3.bf16.msra.mxu1 %v591_v8  ;;  %v473_v46 = vld [vmem:[%s905_s6] ss:$0 sm:$0xff]  ;;  %p694_p4 = scmp.ne.s32.totalorder %s441_s30, %s693_s4  ;;  %p699_p6 = scmp.lt.s32.totalorder %s693_s4, %s693_s4 }
  0x55   :  { %515 = vmatprep.subr.bf16.mxu0 %v729_v0  ;;  %535 = vmatprep.subr.bf16.mxu1 %v729_v0 }
  0x56   :  { %p700_p7 = por %p699_p6, %p698_p5 }
  0x58   :  { %516 = vmatpush3.bf16.msra.mxu0 %v583_v5  ;;  %536 = vmatpush3.bf16.msra.mxu1 %v592_v10  ;;  %p701_p8 = pnand %p700_p7, %p694_p4 }
  0x59   :  { %517 = vmatprep.subr.bf16.mxu0 %v729_v0  ;;  %537 = vmatprep.subr.bf16.mxu1 %v729_v0 }
  0x5c   :  { %518 = vmatpush3.bf16.msra.mxu0 %v584_v7  ;;  %538 = vmatpush3.bf16.msra.mxu1 %v593_v12 }
  0x5d   :  { %519 = vmatprep.subr.bf16.mxu0 %v729_v0  ;;  %539 = vmatprep.subr.bf16.mxu1 %v729_v0 }
  0x60   :  { %520 = vmatpush3.bf16.msra.mxu0 %v585_v9  ;;  %540 = vmatpush3.bf16.msra.mxu1 %v594_v14 }
  0x61   :  { %521 = vmatprep.subr.bf16.mxu0 %v729_v0  ;;  %541 = vmatprep.subr.bf16.mxu1 %v729_v0 }
  0x64   :  { %522 = vmatpush3.bf16.msra.mxu0 %v586_v11  ;;  %542 = vmatpush3.bf16.msra.mxu1 %v595_v16 }
  0x65   :  { %523 = vmatprep.subr.bf16.mxu0 %v729_v0  ;;  %543 = vmatprep.subr.bf16.mxu1 %v729_v0 }
  0x68   :  { %524 = vmatpush3.bf16.msra.mxu0 %v587_v13  ;;  %544 = vmatpush3.bf16.msra.mxu1 %v596_v17 }
  0x69   :  { %549 = vmatprep.subr.bf16.mxu0 %v729_v0 }
  0x6b   :  { %526 = vmatmul.mubr.bf16.vlgmr.msra.gmra.mrb[0].mxu0 %v588_v15 }
  0x6c   :  { %565 = vmatprep.mubr.msk.bf16.mxu0 %vm730_vm0, %v729_v0  ;;  %550 = vmatpush3.bf16.msra.mxu0 %v597_v18 }
  0x6d   :  { %551 = vmatprep.subr.bf16.mxu0 %v729_v0 }
  0x70   :  { %552 = vmatpush3.bf16.msra.mxu0 %v598_v19 }
  0x71   :  { %553 = vmatprep.subr.bf16.mxu0 %v729_v0 }
  0x74   :  { %554 = vmatpush3.bf16.msra.mxu0 %v599_v20 }
  0x75   :  { %555 = vmatprep.subr.bf16.mxu0 %v729_v0 }
  0x78   :  { %556 = vmatpush3.bf16.msra.mxu0 %v600_v21 }
  0x79   :  { %557 = vmatprep.subr.bf16.mxu0 %v729_v0 }
  0x7c   :  { %558 = vmatpush3.bf16.msra.mxu0 %v601_v22 }
  0x7d   :  { %559 = vmatprep.subr.bf16.mxu0 %v729_v0 }
  0x80   :  { %560 = vmatpush3.bf16.msra.mxu0 %v602_v23 }
  0x81   :  { %561 = vmatprep.subr.bf16.mxu0 %v729_v0 }
  0x84   :  { %562 = vmatpush3.bf16.msra.mxu0 %v603_v34 }
  0x85   :  { %563 = vmatprep.subr.bf16.mxu0 %v729_v0 }
  0x88   :  { %564 = vmatpush3.bf16.msra.mxu0 %v604_v35 }
 0x13e   :  { %v196_v25 = vpop.f32.mrb[0].mxu0 }
 0x13f   :  { %v197_v26 = vadd.f32 %v454_v24, %v196_v25  ;;  %v527_v27 = vpop.f32.mrb[1].mxu0 }
 0x140   :  { %v199_v28 = vpop.f32.mrb[2].mxu0 }
 0x141   :  { %v200_v29 = vadd.f32 %v454_v24, %v199_v28  ;;  %v528_v30 = vpop.f32.mrb[3].mxu0  ;;  %v203_v31 = vmax.f32 %v197_v26, 0.0 }
 0x143   :  { %v204_v32 = vmax.f32 %v200_v29, 0.0 }
 0x145   :  { %v205_v33 = vpack.c.bf16 %v204_v32, %v203_v31 }
 0x147   :  { %546 = vmatmul.mubr.bf16.vlgmr.msra.gmra.mrb[0].mxu1 %v205_v33 }
 0x21a   :  { %v311_v37 = vpop.f32.mrb[0].mxu1 }
 0x21b   :  { %v312_v38 = vadd.f32 %v464_v36, %v311_v37  ;;  %v547_v39 = vpop.f32.mrb[1].mxu1 }
 0x21c   :  { %v314_v40 = vpop.f32.mrb[2].mxu1 }
 0x21d   :  { %v315_v41 = vadd.f32 %v464_v36, %v314_v40  ;;  %v548_v42 = vpop.f32.mrb[3].mxu1  ;;  %v318_v43 = vmax.f32 %v312_v38, 0.0 }
 0x21f   :  { %v319_v44 = vmax.f32 %v315_v41, 0.0 }
 0x221   :  { %v320_v45 = vpack.c.bf16 %v319_v44, %v318_v43 }
 0x223   :  { %566 = vmatmul.mubr.bf16.vlgmr.msra.gmra.mrb[4].mxu0 %v320_v45 }
 0x2f6   :  { %v426_v47 = vpop.f32.mrb[4].mxu0 }
 0x2f7   :  { %v427_v48 = vadd.f32 %v473_v46, %v426_v47  ;;  %v567_v49 = vpop.f32.mrb[5].mxu0 }
 0x2f8   :  { %v429_v50 = vpop.f32.mrb[6].mxu0 }
 0x2f9   :  { %433 = vst [vmem:[#allocation10] sm:$0xff] %v427_v48  ;;  %v430_v51 = vadd.f32 %v473_v46, %v429_v50  ;;  %v568_v52 = vpop.f32.mrb[7].mxu0 }
 0x2fb   :  { %434 = vst [vmem:[#allocation10 + $0x8] sm:$0xff] %v430_v51 }
 0x2fc   :  { %704 = shalt.err (!%p701_p8)
}
 0x2fd   :  { %s705_s9 = scalar_lea.hbm %s906_s7, 256 }
 0x2fe   :  { %p706_p9 = scmp.ne.s32.totalorder %s906_s7, %s705_s9  ;;  %p709_p10 = scmp.lt.u32.totalorder %s705_s9, %s906_s7 }
 0x300   :  { %p711_p11 = pnand %p709_p10, %p706_p9 }
 0x302   :  { %714 = shalt.err (!%p711_p11)
}
 0x303   :  { %s732_s16 = smov 128   ;;  %s733_s0 = smov 8  }
 0x304   :  { %446 = dma.vmem_to_hbm [thread:$0]  %s441_s30, 256, %s906_s7, [#allocation4], %s732_s16, %s732_s16, %s733_s0  }
 0x305   :  { %721 = dma.done.wait [#allocation4], 256  }
 0x306   :  { %722 = vsyncadd [#allocation4], 4294967040 }
 0x307   :  { %450 = vsyncpa [#allocation3], 1 }
 0x308   :  { %451 = vsyncpa [#allocation6], 1 }
 0x309   :  { %452 = vsyncpa [#allocation9], 1 }
 0x30a   :  { %453 = vsyncpa [#allocation4], 1 }

</bundles_post_ra>
